<compile_context>
chip_gen: v6e
topology: v6e:2x2x1
jax: 0.10.0
libtpu: 0.0.40
codegen_flags: <defaults>
</compile_context>

<pallas_src>
import math
import re
from functools import partial

import jax
import jax.numpy as jnp
from jax.experimental import pallas as pl
from jax.experimental.pallas import tpu as pltpu


# ---------------------------------------------------------------------------
# Kernel
# ---------------------------------------------------------------------------
def attention_head_kernel(x_ref, wqkv_ref, bqkv_ref, out_ref, scores_ref,
                          k_sc, v_sc, *, use_bf16_exp):
    # x_ref:     (Bb, S, H)   bf16, resident across the query-tile grid axis
    # wqkv_ref:  (3, H, Dh)   bf16   [0]=Wq*scale, [1]=Wk, [2]=Wv
    # bqkv_ref:  (3, Dh)      f32    [0]=bq*scale, [1]=bk, [2]=bv
    # out_ref:   (Bb, Tq, Dh)
    # scores_ref:(Bb, Tq, S)
    # k_sc/v_sc: (Bb, S, Dh)  bf16 scratch, persists across query tiles
    Bb, S, H = x_ref.shape
    Tq = out_ref.shape[1]
    Dh = out_ref.shape[2]
    qi = pl.program_id(1)

    b_all = bqkv_ref[...]                                        # (3, Dh) f32

    # Project K and V for the whole sequence once per batch block.
    @pl.when(qi == 0)
    def _():
        x2d = x_ref[...].reshape(Bb * S, H)                      # bf16 rows
        k = jnp.dot(x2d, wqkv_ref[1],
                    preferred_element_type=jnp.float32) + b_all[1]
        v = jnp.dot(x2d, wqkv_ref[2],
                    preferred_element_type=jnp.float32) + b_all[2]
        k_sc[...] = k.reshape(Bb, S, Dh).astype(k_sc.dtype)
        v_sc[...] = v.reshape(Bb, S, Dh).astype(v_sc.dtype)

    # Q projection for this query tile (scale already folded into W/b).
    start = pl.multiple_of(qi * Tq, Tq)
    xq = x_ref[:, pl.ds(start, Tq), :].reshape(Bb * Tq, H)
    q = jnp.dot(xq, wqkv_ref[0],
                preferred_element_type=jnp.float32) + b_all[0]
    q = q.reshape(Bb, Tq, Dh).astype(jnp.bfloat16)

    # Scores: contract last dims of q and k directly (no explicit transpose).
    s = jnp.einsum('bqd,bkd->bqk', q, k_sc[...],
                   preferred_element_type=jnp.float32)           # (Bb, Tq, S)

    # Numerically-stable softmax; exp in bf16 where the EUP supports it.
    m = jnp.max(s, axis=-1, keepdims=True)
    z = s - m
    if use_bf16_exp:
        p = jnp.exp(z.astype(jnp.bfloat16)).astype(jnp.float32)
    else:
        p = jnp.exp(z)
    denom = jnp.sum(p, axis=-1, keepdims=True)
    attn = p * pl.reciprocal(denom, approx=True)                 # (Bb, Tq, S)

    # dropout(attn) == identity in eval mode.

    ctx = jnp.einsum('bqk,bkd->bqd', attn.astype(jnp.bfloat16), v_sc[...],
                     preferred_element_type=jnp.float32)         # (Bb, Tq, Dh)

    scores_ref[...] = attn.astype(scores_ref.dtype)
    out_ref[...] = ctx.astype(out_ref.dtype)


# ---------------------------------------------------------------------------
# Parameter packing (do once at init, not per call)
# ---------------------------------------------------------------------------
def pack_qkv_params(wq, bq, wk, bk, wv, bv):
    """w*: (H, Dh) pre-transposed nn.Linear weights, b*: (Dh,).

    Folds 1/sqrt(Dh) into the Q projection and packs into
    wqkv (3, H, Dh) bf16 and bqkv (3, Dh) f32.
    """
    Dh = wq.shape[1]
    scale = 1.0 / math.sqrt(Dh)
    wqkv = jnp.stack([wq * scale, wk, wv], axis=0).astype(jnp.bfloat16)
    bqkv = jnp.stack([bq * scale, bk, bv], axis=0).astype(jnp.float32)
    return wqkv, bqkv


# ---------------------------------------------------------------------------
# Chip-aware sizing helpers
# ---------------------------------------------------------------------------
def _tpu_generation():
    try:
        kind = jax.devices()[0].device_kind
    except Exception:
        return 0
    m = re.search(r"(\d+)", kind)
    return int(m.group(1)) if m else 0


def _choose_tq(S, max_tq=256):
    if S <= max_tq:
        return S
    for t in range(max_tq, 7, -8):          # multiples of 8, divisor of S
        if S % t == 0:
            return t
    return S


def _vmem_bytes_per_step(block_b, tq, S, H, Dh, out_bytes, sc_bytes):
    bf = 2
    b = 0
    b += 2 * block_b * S * H * bf            # x block (double-buffered, bf16)
    b += 2 * 3 * H * Dh * bf                 # packed weights
    b += 2 * 3 * Dh * 4                      # biases
    b += 2 * block_b * tq * Dh * out_bytes   # context output block
    b += 2 * block_b * tq * S * sc_bytes     # scores output block
    b += 2 * block_b * S * Dh * bf           # K/V scratch
    # f32 in-kernel temporaries: q, s, p, attn, and K/V projection at qi==0
    b += block_b * (tq * Dh + 3 * tq * S + 2 * S * Dh + tq * H) * 4
    return b


# ---------------------------------------------------------------------------
# Wrapper
# ---------------------------------------------------------------------------
def attention_head(x, wqkv, bqkv, *, scores_dtype=jnp.bfloat16,
                   block_b=None, tq=None):
    """x: (B, S, H).  wqkv/bqkv: output of pack_qkv_params.

    Returns (context (B, S, Dh) in x.dtype, attention_scores (B, S, S) in
    scores_dtype).  Pass scores_dtype=x.dtype for exact dtype parity with the
    PyTorch module (bf16 default halves the largest HBM writeback).
    """
    B, S, H = x.shape
    Dh = wqkv.shape[-1]
    gen = _tpu_generation()

    # VMEM budget per chip generation (v7x has 64 MiB/TC; v5e/v6e have 128 MiB).
    if gen >= 7 or gen == 0:
        vmem_limit = 48 * 1024 * 1024
        budget = 24 * 1024 * 1024
    else:
        vmem_limit = 80 * 1024 * 1024
        budget = 48 * 1024 * 1024

    if tq is None:
        tq = _choose_tq(S)
    assert S % tq == 0, "query tile must divide sequence length"

    if block_b is None:
        sc_b = jnp.dtype(scores_dtype).itemsize
        out_b = jnp.dtype(x.dtype).itemsize
        block_b = 1
        for cand in range(B, 0, -1):
            if B % cand:
                continue
            if _vmem_bytes_per_step(cand, tq, S, H, Dh, out_b, sc_b) <= budget:
                block_b = cand
                break
        if gen >= 7 and B >= 2:
            # Only v7x has 2 TensorCores: keep >=2 batch grid steps so the
            # "parallel" axis can split across both cores.
            cap = pl.cdiv(B, 2)
            if block_b > cap:
                block_b = cap
        while B % block_b:
            block_b -= 1

    grid = (B // block_b, S // tq)
    use_bf16_exp = gen >= 6          # v5e has no bf16 EUP/VPU; keep f32 there

    kernel = partial(attention_head_kernel, use_bf16_exp=use_bf16_exp)

    out, scores = pl.pallas_call(
        kernel,
        out_shape=(
            jax.ShapeDtypeStruct((B, S, Dh), x.dtype),
            jax.ShapeDtypeStruct((B, S, S), scores_dtype),
        ),
        grid_spec=pltpu.PrefetchScalarGridSpec(
            num_scalar_prefetch=0,
            grid=grid,
            in_specs=[
                # x block resident across the query-tile axis (same index)
                pl.BlockSpec((block_b, S, H), lambda b, qi: (b, 0, 0)),
                pl.BlockSpec((3, H, Dh), lambda b, qi: (0, 0, 0)),
                pl.BlockSpec((3, Dh), lambda b, qi: (0, 0)),
            ],
            out_specs=[
                pl.BlockSpec((block_b, tq, Dh), lambda b, qi: (b, qi, 0)),
                pl.BlockSpec((block_b, tq, S), lambda b, qi: (b, qi, 0)),
            ],
            scratch_shapes=[
                pltpu.VMEM((block_b, S, Dh), jnp.bfloat16),   # K
                pltpu.VMEM((block_b, S, Dh), jnp.bfloat16),   # V
            ],
        ),
        compiler_params=pltpu.CompilerParams(
            dimension_semantics=("parallel", "arbitrary"),
            vmem_limit_bytes=vmem_limit,
        ),
    )(x.astype(jnp.bfloat16), wqkv, bqkv)
    return out, scores


# ---------------------------------------------------------------------------
# Pure-JAX reference
# ---------------------------------------------------------------------------
def reference(x, wq, bq, wk, bk, wv, bv):
    q = x @ wq + bq
    k = x @ wk + bk
    v = x @ wv + bv
    s = (q @ jnp.swapaxes(k, -2, -1)) / math.sqrt(wq.shape[1])
    attn = jax.nn.softmax(s, axis=-1)
    return attn @ v, attn


if __name__ == "__main__":
    # small shapes consistent with the module: batch=2, seq=8, hidden=32, head=16
    B, S, H, Dh = 2, 8, 32, 16

    key = jax.random.PRNGKey(0)
    kx, kwq, kbq, kwk, kbk, kwv, kbv = jax.random.split(key, 7)

    x = jax.random.normal(kx, (B, S, H), dtype=jnp.float32)

    # nn.Linear(hidden, head): weight (head, hidden), bias (head,);
    # pre-transposed weights to (hidden, head) for y = x @ W + b.
    bound = 1.0 / math.sqrt(H)
    wq = jax.random.uniform(kwq, (H, Dh), jnp.float32, -bound, bound)
    wk = jax.random.uniform(kwk, (H, Dh), jnp.float32, -bound, bound)
    wv = jax.random.uniform(kwv, (H, Dh), jnp.float32, -bound, bound)
    bq = jax.random.uniform(kbq, (Dh,), jnp.float32, -bound, bound)
    bk = jax.random.uniform(kbk, (Dh,), jnp.float32, -bound, bound)
    bv = jax.random.uniform(kbv, (Dh,), jnp.float32, -bound, bound)

    # Pack once (init-time), not per call.
    wqkv, bqkv = pack_qkv_params(wq, bq, wk, bk, wv, bv)

    out, scores = attention_head(x, wqkv, bqkv)
    out = jax.block_until_ready(out)
    scores = jax.block_until_ready(scores)

    ref_out, ref_scores = reference(x, wq, bq, wk, bk, wv, bv)
    # bf16 MXU operands / bf16 scores / approx reciprocal => loose tolerance.
    assert jnp.allclose(out, ref_out, atol=2e-2, rtol=2e-2), \
        float(jnp.max(jnp.abs(out - ref_out)))
    assert jnp.allclose(scores.astype(jnp.float32), ref_scores,
                        atol=2e-2, rtol=2e-2), \
        float(jnp.max(jnp.abs(scores.astype(jnp.float32) - ref_scores)))

    print("KERNEL_OK")
</pallas_src>

<mosaic_0001>
module attributes {stable_mosaic.version = 11 : i64} {
  func.func @attention_head_kernel(%arg0: i32, %arg1: i32, %arg2: memref<2x8x32xbf16, #tpu.memory_space<vmem>>, %arg3: memref<3x32x16xbf16, #tpu.memory_space<vmem>>, %arg4: memref<3x16xf32, #tpu.memory_space<vmem>>, %arg5: memref<2x8x16xf32, #tpu.memory_space<vmem>>, %arg6: memref<2x8x8xbf16, #tpu.memory_space<vmem>>, %arg7: memref<2x8x16xbf16, #tpu.memory_space<vmem>>, %arg8: memref<2x8x16xbf16, #tpu.memory_space<vmem>>) attributes {dimension_semantics = [#tpu.dimension_semantics<parallel>, #tpu.dimension_semantics<arbitrary>], iteration_bounds = array<i64: 1, 1>, scalar_prefetch = 0 : i64, scratch_operands = 2 : i64, tpu.core_type = #tpu.core_type<tc>, window_params = [{transform_indices = @transform_0, window_bounds = array<i64: 2, 8, 32>}, {pipeline_mode = #tpu.pipeline_mode<synchronous>, transform_indices = @transform_1, window_bounds = array<i64: 3, 32, 16>}, {pipeline_mode = #tpu.pipeline_mode<synchronous>, transform_indices = @transform_2, window_bounds = array<i64: 3, 16>}, {transform_indices = @transform_3, window_bounds = array<i64: 2, 8, 16>}, {transform_indices = @transform_4, window_bounds = array<i64: 2, 8, 8>}]} {
    %c0 = arith.constant 0 : index
    %c0_0 = arith.constant 0 : index
    %0 = vector.load %arg4[%c0, %c0_0] : memref<3x16xf32, #tpu.memory_space<vmem>>, vector<3x16xf32>
    %c0_i32 = arith.constant 0 : i32
    %1 = arith.cmpi eq, %arg1, %c0_i32 : i32
    %2 = arith.extui %1 : i1 to i32
    %c0_i32_1 = arith.constant 0 : i32
    %3 = arith.cmpi ne, %2, %c0_i32_1 : i32
    scf.if %3 {
      %c0_23 = arith.constant 0 : index
      %c0_24 = arith.constant 0 : index
      %c0_25 = arith.constant 0 : index
      %37 = vector.load %arg2[%c0_23, %c0_24, %c0_25] : memref<2x8x32xbf16, #tpu.memory_space<vmem>>, vector<2x8x32xbf16>
      %38 = vector.shape_cast %37 : vector<2x8x32xbf16> to vector<16x32xbf16>
      %c1 = arith.constant 1 : index
      %c0_26 = arith.constant 0 : index
      %c0_27 = arith.constant 0 : index
      %39 = vector.load %arg3[%c1, %c0_26, %c0_27] : memref<3x32x16xbf16, #tpu.memory_space<vmem>>, vector<1x32x16xbf16>
      %40 = vector.shape_cast %39 : vector<1x32x16xbf16> to vector<32x16xbf16>
      %cst_28 = arith.constant dense<0.000000e+00> : vector<16x16xf32>
      %41 = tpu.matmul %38, %40, %cst_28 {dimension_numbers = #tpu.dot_dimension_numbers<[1], [0], [0], [1], [0, 0, 1, 1], [], []>} : vector<16x32xbf16>, vector<32x16xbf16>, vector<16x16xf32> -> vector<16x16xf32>
      %42 = vector.extract_strided_slice %0 {offsets = [1, 0], sizes = [1, 16], strides = [1, 1]} : vector<3x16xf32> to vector<1x16xf32>
      %43 = vector.shape_cast %42 : vector<1x16xf32> to vector<16xf32>
      %44 = vector.shape_cast %43 : vector<16xf32> to vector<1x16xf32>
      %45 = vector.broadcast %44 : vector<1x16xf32> to vector<16x16xf32>
      %46 = arith.addf %41, %45 : vector<16x16xf32>
      %c2 = arith.constant 2 : index
      %c0_29 = arith.constant 0 : index
      %c0_30 = arith.constant 0 : index
      %47 = vector.load %arg3[%c2, %c0_29, %c0_30] : memref<3x32x16xbf16, #tpu.memory_space<vmem>>, vector<1x32x16xbf16>
      %48 = vector.shape_cast %47 : vector<1x32x16xbf16> to vector<32x16xbf16>
      %cst_31 = arith.constant dense<0.000000e+00> : vector<16x16xf32>
      %49 = tpu.matmul %38, %48, %cst_31 {dimension_numbers = #tpu.dot_dimension_numbers<[1], [0], [0], [1], [0, 0, 1, 1], [], []>} : vector<16x32xbf16>, vector<32x16xbf16>, vector<16x16xf32> -> vector<16x16xf32>
      %50 = vector.extract_strided_slice %0 {offsets = [2, 0], sizes = [1, 16], strides = [1, 1]} : vector<3x16xf32> to vector<1x16xf32>
      %51 = vector.shape_cast %50 : vector<1x16xf32> to vector<16xf32>
      %52 = vector.shape_cast %51 : vector<16xf32> to vector<1x16xf32>
      %53 = vector.broadcast %52 : vector<1x16xf32> to vector<16x16xf32>
      %54 = arith.addf %49, %53 : vector<16x16xf32>
      %55 = vector.shape_cast %46 : vector<16x16xf32> to vector<2x8x16xf32>
      %56 = arith.truncf %55 : vector<2x8x16xf32> to vector<2x8x16xbf16>
      %c0_32 = arith.constant 0 : index
      %c0_33 = arith.constant 0 : index
      %c0_34 = arith.constant 0 : index
      %57 = vector.load %arg7[%c0_32, %c0_33, %c0_34] : memref<2x8x16xbf16, #tpu.memory_space<vmem>>, vector<2x8x16xbf16>
      tpu.vector_store %arg7[%c0_32, %c0_33, %c0_34], %56 {strides = array<i32>} : memref<2x8x16xbf16, #tpu.memory_space<vmem>>, vector<2x8x16xbf16>,
      %58 = vector.shape_cast %54 : vector<16x16xf32> to vector<2x8x16xf32>
      %59 = arith.truncf %58 : vector<2x8x16xf32> to vector<2x8x16xbf16>
      %c0_35 = arith.constant 0 : index
      %c0_36 = arith.constant 0 : index
      %c0_37 = arith.constant 0 : index
      %60 = vector.load %arg8[%c0_35, %c0_36, %c0_37] : memref<2x8x16xbf16, #tpu.memory_space<vmem>>, vector<2x8x16xbf16>
      tpu.vector_store %arg8[%c0_35, %c0_36, %c0_37], %59 {strides = array<i32>} : memref<2x8x16xbf16, #tpu.memory_space<vmem>>, vector<2x8x16xbf16>,
    } else {
    }
    %c8_i32 = arith.constant 8 : i32
    %4 = arith.muli %arg1, %c8_i32 : i32
    %5 = tpu.assume_multiple %4, 8 : i32
    %c0_2 = arith.constant 0 : index
    %6 = arith.index_cast %5 : i32 to index
    %c0_3 = arith.constant 0 : index
    %7 = vector.load %arg2[%c0_2, %6, %c0_3] : memref<2x8x32xbf16, #tpu.memory_space<vmem>>, vector<2x8x32xbf16>
    %8 = vector.shape_cast %7 : vector<2x8x32xbf16> to vector<16x32xbf16>
    %c0_4 = arith.constant 0 : index
    %c0_5 = arith.constant 0 : index
    %c0_6 = arith.constant 0 : index
    %9 = vector.load %arg3[%c0_4, %c0_5, %c0_6] : memref<3x32x16xbf16, #tpu.memory_space<vmem>>, vector<1x32x16xbf16>
    %10 = vector.shape_cast %9 : vector<1x32x16xbf16> to vector<32x16xbf16>
    %cst = arith.constant dense<0.000000e+00> : vector<16x16xf32>
    %11 = tpu.matmul %8, %10, %cst {dimension_numbers = #tpu.dot_dimension_numbers<[1], [0], [0], [1], [0, 0, 1, 1], [], []>} : vector<16x32xbf16>, vector<32x16xbf16>, vector<16x16xf32> -> vector<16x16xf32>
    %12 = vector.extract_strided_slice %0 {offsets = [0, 0], sizes = [1, 16], strides = [1, 1]} : vector<3x16xf32> to vector<1x16xf32>
    %13 = vector.shape_cast %12 : vector<1x16xf32> to vector<16xf32>
    %14 = vector.shape_cast %13 : vector<16xf32> to vector<1x16xf32>
    %15 = vector.broadcast %14 : vector<1x16xf32> to vector<16x16xf32>
    %16 = arith.addf %11, %15 : vector<16x16xf32>
    %17 = vector.shape_cast %16 : vector<16x16xf32> to vector<2x8x16xf32>
    %18 = arith.truncf %17 : vector<2x8x16xf32> to vector<2x8x16xbf16>
    %c0_7 = arith.constant 0 : index
    %c0_8 = arith.constant 0 : index
    %c0_9 = arith.constant 0 : index
    %19 = vector.load %arg7[%c0_7, %c0_8, %c0_9] : memref<2x8x16xbf16, #tpu.memory_space<vmem>>, vector<2x8x16xbf16>
    "tpu.trace_start"() <{level = 10 : i32, message = "bqd,bkd->bqk"}> : () -> ()
    %cst_10 = arith.constant dense<0.000000e+00> : vector<2x8x8xf32>
    %20 = tpu.matmul %18, %19, %cst_10 {dimension_numbers = #tpu.dot_dimension_numbers<[2], [2], [1], [1], [0, 0, 0, 1, 1, 1], [0], [0]>} : vector<2x8x16xbf16>, vector<2x8x16xbf16>, vector<2x8x8xf32> -> vector<2x8x8xf32>
    "tpu.trace_stop"() : () -> ()
    %cst_11 = arith.constant dense<0xFF800000> : vector<2x8xf32>
    %21 = vector.multi_reduction <maximumf>, %20, %cst_11 [2] : vector<2x8x8xf32> to vector<2x8xf32>
    %22 = vector.shape_cast %21 : vector<2x8xf32> to vector<2x8x1xf32>
    %23 = vector.broadcast %22 : vector<2x8x1xf32> to vector<2x8x8xf32>
    %24 = arith.subf %20, %23 : vector<2x8x8xf32>
    %25 = math.exp %24 : vector<2x8x8xf32>
    %cst_12 = arith.constant dense<0.000000e+00> : vector<2x8xf32>
    %26 = vector.multi_reduction <add>, %25, %cst_12 [2] : vector<2x8x8xf32> to vector<2x8xf32>
    %27 = vector.shape_cast %26 : vector<2x8xf32> to vector<2x8x1xf32>
    %28 = tpu.reciprocal %27 {approx = true} : vector<2x8x1xf32> -> vector<2x8x1xf32>
    %29 = vector.broadcast %28 : vector<2x8x1xf32> to vector<2x8x8xf32>
    %30 = arith.mulf %25, %29 : vector<2x8x8xf32>
    %31 = arith.truncf %30 : vector<2x8x8xf32> to vector<2x8x8xbf16>
    %c0_13 = arith.constant 0 : index
    %c0_14 = arith.constant 0 : index
    %c0_15 = arith.constant 0 : index
    %32 = vector.load %arg8[%c0_13, %c0_14, %c0_15] : memref<2x8x16xbf16, #tpu.memory_space<vmem>>, vector<2x8x16xbf16>
    "tpu.trace_start"() <{level = 10 : i32, message = "bqk,bkd->bqd"}> : () -> ()
    %cst_16 = arith.constant dense<0.000000e+00> : vector<2x8x16xf32>
    %33 = tpu.matmul %31, %32, %cst_16 {dimension_numbers = #tpu.dot_dimension_numbers<[2], [1], [1], [2], [0, 0, 0, 1, 1, 2], [0], [0]>} : vector<2x8x8xbf16>, vector<2x8x16xbf16>, vector<2x8x16xf32> -> vector<2x8x16xf32>
    "tpu.trace_stop"() : () -> ()
    %34 = arith.truncf %30 : vector<2x8x8xf32> to vector<2x8x8xbf16>
    %c0_17 = arith.constant 0 : index
    %c0_18 = arith.constant 0 : index
    %c0_19 = arith.constant 0 : index
    %35 = vector.load %arg6[%c0_17, %c0_18, %c0_19] : memref<2x8x8xbf16, #tpu.memory_space<vmem>>, vector<2x8x8xbf16>
    tpu.vector_store %arg6[%c0_17, %c0_18, %c0_19], %34 {strides = array<i32>} : memref<2x8x8xbf16, #tpu.memory_space<vmem>>, vector<2x8x8xbf16>,
    %c0_20 = arith.constant 0 : index
    %c0_21 = arith.constant 0 : index
    %c0_22 = arith.constant 0 : index
    %36 = vector.load %arg5[%c0_20, %c0_21, %c0_22] : memref<2x8x16xf32, #tpu.memory_space<vmem>>, vector<2x8x16xf32>
    tpu.vector_store %arg5[%c0_20, %c0_21, %c0_22], %33 {strides = array<i32>} : memref<2x8x16xf32, #tpu.memory_space<vmem>>, vector<2x8x16xf32>,
    return
  }
  func.func @transform_0(%arg0: i32, %arg1: i32) -> (i32, i32, i32) {
    %c0_i32 = arith.constant 0 : i32
    %c0_i32_0 = arith.constant 0 : i32
    %c0_i32_1 = arith.constant 0 : i32
    return %arg0, %c0_i32, %c0_i32_0 : i32, i32, i32
  }
  func.func @transform_1(%arg0: i32, %arg1: i32) -> (i32, i32, i32) {
    %c0_i32 = arith.constant 0 : i32
    %c0_i32_0 = arith.constant 0 : i32
    %c0_i32_1 = arith.constant 0 : i32
    %c0_i32_2 = arith.constant 0 : i32
    return %c0_i32, %c0_i32_0, %c0_i32_1 : i32, i32, i32
  }
  func.func @transform_2(%arg0: i32, %arg1: i32) -> (i32, i32) {
    %c0_i32 = arith.constant 0 : i32
    %c0_i32_0 = arith.constant 0 : i32
    %c0_i32_1 = arith.constant 0 : i32
    return %c0_i32, %c0_i32_0 : i32, i32
  }
  func.func @transform_3(%arg0: i32, %arg1: i32) -> (i32, i32, i32) {
    %c0_i32 = arith.constant 0 : i32
    %c0_i32_0 = arith.constant 0 : i32
    return %arg0, %arg1, %c0_i32 : i32, i32, i32
  }
  func.func @transform_4(%arg0: i32, %arg1: i32) -> (i32, i32, i32) {
    %c0_i32 = arith.constant 0 : i32
    %c0_i32_0 = arith.constant 0 : i32
    return %arg0, %arg1, %c0_i32 : i32, i32, i32
  }
}

</mosaic_0001>

<bundles_post_ra>
// kernel: tpu_custom_call.1
= control target key start
LH: loop header
LB: loop body
LE: loop exit
PB: predicated region body
PF: predicated region fallthrough
CT: control target
= control target key end

     0   :  { %10 = vsyncpa [#allocation5], 0  ;;  %v657_v1 = vmov 0.0   ;;  %vm658_vm0 = vmmov 0   ;;  %vm52_vm1 = vcmask 261120   ;;  %s766_s0 = inlined_call_operand.vmem [shape: bf16[2,8,32], index: 0, kind: input, shape index: {}]   ;;  %s767_s1 = inlined_call_operand.vmem [shape: bf16[3,32,16], index: 1, kind: input, shape index: {}]   ;;  %s768_s2 = inlined_call_operand.vmem [shape: f32[3,16], index: 2, kind: input, shape index: {}]   ;;  %s769_s3 = inlined_call_operand.hbm [shape: f32[2,8,16], index: 3, kind: output, shape index: {0}]   ;;  %s770_s4 = inlined_call_operand.hbm [shape: bf16[2,8,8], index: 4, kind: output, shape index: {1}]  }
   0x1   :  { %v597_v0 = vld [vmem:[%s767_s1 + $0x18] sm:$0xff]   ;;  %541 = vmatprep.subr.bf16.mxu0 %v657_v1  ;;  %549 = vmatprep.subr.bf16.mxu1 %v657_v1  ;;  %v598_v2 = vld [vmem:[%s767_s1 + $0x10] sm:$0xff]   ;;  %v599_v3 = vld [vmem:[%s766_s0] sm:$0xff]  }
   0x2   :  { %542 = vmatpush3.bf16.msra.mxu0 %v597_v0  ;;  %545 = vmatprep.mubr.msk.bf16.mxu0 %vm658_vm0, %v657_v1  ;;  %v600_v4 = vld [vmem:[%s767_s1 + $0x8] sm:$0xff]  }
   0x3   :  { %543 = vmatprep.subr.bf16.mxu0 %v657_v1  ;;  %553 = vmatprep.mubr.msk.bf16.mxu1 %vm658_vm0, %v657_v1 }
   0x6   :  { %544 = vmatpush3.bf16.msra.mxu0 %v598_v2 }
   0x7   :  { %557 = vmatprep.subr.bf16.mxu0 %v657_v1 }
   0x8   :  { %11 = vsyncpa [#allocation7], 0  ;;  %v601_v5 = vld [vmem:[%s767_s1] sm:$0xff]   ;;  %v603_v7 = vld [vmem:[%s767_s1 + $0x28] sm:$0xff]   ;;  %v31_v9 = vlaneseq  ;;  %vm161_vm2 = vcmask 125952   ;;  %vm249_vm3 = vcmask 130048  }
   0x9   :  { %546 = vmatmul.mubr.msk.bf16.vlgmr.msra.gmra.mxu0 %vm52_vm1, %v599_v3  ;;  %v602_v6 = vld [vmem:[%s766_s0] sm:$0xff]   ;;  %550 = vmatpush3.bf16.msra.mxu1 %v603_v7  ;;  %vm372_vm4 = vcmask 1043456   ;;  %vm342_vm5 = vcmask 64512   ;;  %vm462_vm6 = vcmask 60416  }
   0xa   :  { %558 = vmatpush3.bf16.msra.mxu0 %v600_v4  ;;  %561 = vmatprep.mubr.msk.bf16.mxu0 %vm658_vm0, %v657_v1  ;;  %v604_v8 = vld [vmem:[%s767_s1 + $0x20] sm:$0xff]   ;;  %v32_v10 = vshrl.u32 %v31_v9, 7  ;;  %s659_s1 = smov [#allocation6]  }
   0xb   :  { %559 = vmatprep.subr.bf16.mxu0 %v657_v1  ;;  %551 = vmatprep.subr.bf16.mxu1 %v657_v1  ;;  %v19_v12 = vld [vmem:[%s768_s2] sm:$0x7]  ;;  %s484_s2 = sshll.u32 %s659_s1, 4  ;;  %s485_s2 = int_to_ptr.vmem [resolvable:$true] %s484_s2 }
   0xc   :  { %v33_v11 = vsub.s32 1, %v32_v10  ;;  %v181_v20 = vsub.s32 0, %v32_v10  ;;  %v104_v36 = vsub.s32 2, %v32_v10  ;;  %s613_s6 = scalar_lea.vmem %s485_s2, 128  ;;  %p618_p1 = scmp.lt.s32.totalorder %s485_s2, %s485_s2 }
   0xd   :  { %552 = vmatpush3.bf16.msra.mxu1 %v604_v8  ;;  %p614_p0 = scmp.ne.s32.totalorder %s485_s2, %s613_s6  ;;  %p619_p2 = scmp.lt.s32.totalorder %s613_s6, %s613_s6 }
   0xe   :  { %560 = vmatpush3.bf16.msra.mxu0 %v601_v5  ;;  %565 = vmatprep.subr.bf16.mxu1 %v657_v1  ;;  %v34_v13 = vrot.slane %v19_v12, %v33_v11  ;;  %v182_v24 = vrot.slane %v19_v12, %v181_v20  ;;  %v105_v37 = vrot.slane %v19_v12, %v104_v36 }
   0xf   :  { %571 = vmatprep.subr.bf16.mxu0 %v657_v1  ;;  %p620_p3 = por %p619_p2, %p618_p1 }
  0x10   :  { %554 = vmatmul.mubr.msk.bf16.vlgmr.msra.gmra.mxu1 %vm52_vm1, %v599_v3 }
  0x11   :  { %562 = vmatmul.mubr.msk.bf16.vlgmr.msra.gmra.mxu0 %vm52_vm1, %v602_v6  ;;  %567 = vmatprep.mubr.msk.bf16.mxu1 %vm658_vm0, %v657_v1  ;;  %p621_p4 = pnand %p620_p3, %p614_p0 }
  0x12   :  { %573 = vmatprep.mubr.msk.bf16.mxu0 %vm658_vm0, %v657_v1 }
  0xc9   :  { %v90_v14 = vpop.f32.mrf.mxu0 }
  0xca   :  { %v91_v15 = vadd.f32 %v90_v14, %v34_v13 }
  0xcb   :  { %v547_v16 = vpop.f32.mrf.mxu0 }
  0xcc   :  { %v159_v17 = vpack.c.bf16 %v91_v15, %v91_v15 }
  0xcd   :  { %v93_v18 = vpop.f32.mrf.mxu0 }
  0xce   :  { %162 = vst.msk [vmem:[#allocation2] sm:$0xf] %vm161_vm2, %v159_v17  ;;  %v94_v19 = vadd.f32 %v93_v18, %v34_v13 }
  0xcf   :  { %v548_v21 = vpop.f32.mrf.mxu0 }
  0xd0   :  { %v160_v22 = vpack.c.bf16 %v94_v19, %v94_v19  ;;  %v152_v38 = vpop.f32.mrf.mxu1 }
  0xd1   :  { %v238_v23 = vpop.f32.mrf.mxu0  ;;  %v153_v39 = vadd.f32 %v152_v38, %v105_v37 }
  0xd2   :  { %163 = vst.msk [vmem:[#allocation2 + $0x4] sm:$0xf] %vm161_vm2, %v160_v22  ;;  %v239_v28 = vadd.f32 %v238_v23, %v182_v24  ;;  %v555_v40 = vpop.f32.mrf.mxu1 }
  0xd3   :  { %v563_v25 = vpop.f32.mrf.mxu0  ;;  %v164_v41 = vpack.c.bf16 %v153_v39, %v153_v39 }
  0xd4   :  { %v245_v32 = vpack.c.bf16 %v239_v28, %v239_v28  ;;  %v155_v42 = vpop.f32.mrf.mxu1 }
  0xd5   :  { %v247_v26 = vld [vmem:[#allocation2] sm:$0xf]  ;;  %v241_v27 = vpop.f32.mrf.mxu0  ;;  %166 = vst.msk [vmem:[#allocation3] sm:$0xf] %vm161_vm2, %v164_v41  ;;  %v156_v43 = vadd.f32 %v155_v42, %v105_v37 }
  0xd6   :  { %v254_v29 = vsel %vm249_vm3, %v247_v26, 0  ;;  %v242_v34 = vadd.f32 %v241_v27, %v182_v24  ;;  %v556_v44 = vpop.f32.mrf.mxu1 }
  0xd7   :  { %566 = vmatpush3.bf16.xpose.msra.mxu1 %v254_v29  ;;  %v564_v30 = vpop.f32.mrf.mxu0  ;;  %v165_v45 = vpack.c.bf16 %v156_v43, %v156_v43 }
  0xd8   :  { %577 = vmatprep.subr.bf16.mxu1 %v657_v1  ;;  %v246_v35 = vpack.c.bf16 %v242_v34, %v242_v34 }
  0xd9   :  { %v248_v31 = vld [vmem:[#allocation2 + $0x4] sm:$0xf]  ;;  %167 = vst.msk [vmem:[#allocation3 + $0x4] sm:$0xf] %vm161_vm2, %v165_v45 }
  0xda   :  { %v300_v33 = vsel %vm249_vm3, %v248_v31, 0 }
  0xdb   :  { %572 = vmatpush3.bf16.xpose.msra.mxu0 %v300_v33 }
  0xdc   :  { %583 = vmatprep.subr.bf16.mxu0 %v657_v1  ;;  %v367_v46 = vld [vmem:[#allocation3] sm:$0xf] }
  0xdd   :  { %v374_v48 = vsel %vm372_vm4, %v367_v46, 0 }
  0xde   :  { %568 = vmatmul.mubr.msk.bf16.vlgmr.msra.gmra.mxu1 %vm249_vm3, %v245_v32 }
  0xdf   :  { %579 = vmatprep.mubr.msk.bf16.mxu1 %vm658_vm0, %v657_v1  ;;  %578 = vmatpush3.bf16.msra.mxu1 %v374_v48 }
  0xe0   :  { %v368_v47 = vld [vmem:[#allocation3 + $0x4] sm:$0xf] }
  0xe1   :  { %v420_v49 = vsel %vm372_vm4, %v368_v47, 0 }
  0xe2   :  { %574 = vmatmul.mubr.msk.bf16.vlgmr.msra.gmra.mxu0 %vm249_vm3, %v246_v35 }
  0xe3   :  { %585 = vmatprep.mubr.msk.bf16.mxu0 %vm658_vm0, %v657_v1  ;;  %584 = vmatpush3.bf16.msra.mxu0 %v420_v49 }
 0x19e   :  { %v290_v50 = vpop.f32.mrf.mxu1 }
 0x19f   :  { %v343_v51 = vsel %vm342_vm5, %v290_v50, -inf }
 0x1a0   :  { %344 = vmax.xlane.f32.xlu0 %v343_v51  ;;  %v569_v52 = vpop.f32.mrf.mxu1 }
 0x1a2   :  { %v293_v53 = vpop.f32.mrf.mxu1  ;;  %v336_v54 = vpop.f32.mrf.mxu0 }
 0x1a3   :  { %v346_v55 = vsel %vm342_vm5, %v336_v54, -inf }
 0x1a4   :  { %v575_v56 = vpop.f32.mrf.mxu0  ;;  %347 = vmax.xlane.f32.xlu0 %v346_v55  ;;  %v570_v57 = vpop.f32.mrf.mxu1 }
 0x1a6   :  { %v339_v58 = vpop.f32.mrf.mxu0 }
 0x1a8   :  { %v576_v59 = vpop.f32.mrf.mxu0 }
 0x229   :  { %v345_v60 = vpop.xlane.xlu0 %344 }
 0x22a   :  { %v349_v61 = vsub.f32 %v290_v50, %v345_v60 }
 0x22c   :  { %v351_v62 = vmul.f32 1.442695, %v349_v61 }
 0x22d   :  { %v348_v63 = vpop.xlane.xlu0 %347 }
 0x22e   :  { %605 = vpow2.f32 %v351_v62  ;;  %v350_v0 = vsub.f32 %v336_v54, %v348_v63 }
 0x230   :  { %v353_v1 = vmul.f32 1.442695, %v350_v0 }
 0x232   :  { %607 = vpow2.f32 %v353_v1 }
 0x23b   :  { %v606_v2 = vpop.eup %605 }
 0x23c   :  { %v355_v3 = vsel %vm342_vm5, %v606_v2, 0.0 }
 0x23d   :  { %356 = vadd.xlane.f32.xlu1 %v355_v3 }
 0x23f   :  { %v608_v4 = vpop.eup %607 }
 0x240   :  { %v358_v5 = vsel %vm342_vm5, %v608_v4, 0.0 }
 0x241   :  { %359 = vadd.xlane.f32.xlu1 %v358_v5 }
 0x2c6   :  { %v357_v6 = vpop.xlane.xlu1 %356 }
 0x2c7   :  { %609 = vrcp.f32 %v357_v6 }
 0x2ca   :  { %v360_v7 = vpop.xlane.xlu1 %359 }
 0x2cb   :  { %611 = vrcp.f32 %v360_v7 }
 0x2d4   :  { %v610_v8 = vpop.eup %609 }
 0x2d5   :  { %v363_v9 = vmul.f32 %v610_v8, %v606_v2 }
 0x2d7   :  { %v365_v10 = vpack.c.bf16 %v363_v9, %v363_v9 }
 0x2d8   :  { %v612_v11 = vpop.eup %611 }
 0x2d9   :  { %580 = vmatmul.mubr.msk.bf16.vlgmr.msra.gmra.mxu1 %vm342_vm5, %v365_v10  ;;  %v364_v12 = vmul.f32 %v612_v11, %v608_v4  ;;  %463 = vst.msk [vmem:[#allocation6] sm:$0xf] %vm462_vm6, %v365_v10 }
 0x2db   :  { %v366_v13 = vpack.c.bf16 %v364_v12, %v364_v12 }
 0x2dd   :  { %586 = vmatmul.mubr.msk.bf16.vlgmr.msra.gmra.mxu0 %vm342_vm5, %v366_v13  ;;  %464 = vst.msk [vmem:[#allocation6 + $0x4] sm:$0xf] %vm462_vm6, %v366_v13 }
 0x2de   :  { %624 = shalt.err (!%p621_p4)
}
 0x2df   :  { %s660_s7 = smov 64   ;;  %s661_s8 = smov 4  }
 0x2e0   :  { %490 = dma.vmem_to_hbm [thread:$0]  %s485_s2, 128, %s770_s4, [#allocation7], %s660_s7, %s660_s7, %s661_s8  }
 0x2e1   :  { %s662_s11 = smov [#allocation4]  }
 0x2e2   :  { %s472_s12 = sshll.u32 %s662_s11, 4  ;;  %s473_s12 = int_to_ptr.vmem [resolvable:$true] %s472_s12 }
 0x2e3   :  { %s633_s13 = scalar_lea.vmem %s473_s12, 256  ;;  %p638_p6 = scmp.lt.s32.totalorder %s473_s12, %s473_s12 }
 0x2e4   :  { %p634_p5 = scmp.ne.s32.totalorder %s473_s12, %s633_s13  ;;  %p639_p7 = scmp.lt.s32.totalorder %s633_s13, %s633_s13 }
 0x2e6   :  { %p640_p8 = por %p639_p7, %p638_p6 }
 0x2e8   :  { %p641_p9 = pnand %p640_p8, %p634_p5 }
 0x399   :  { %v410_v14 = vpop.f32.mrf.mxu1 }
 0x39a   :  { %465 = vst.msk [vmem:[#allocation4] sm:$0xff] %vm249_vm3, %v410_v14 }
 0x39b   :  { %v581_v15 = vpop.f32.mrf.mxu1 }
 0x39d   :  { %v413_v16 = vpop.f32.mrf.mxu1  ;;  %v456_v17 = vpop.f32.mrf.mxu0 }
 0x39e   :  { %466 = vst.msk [vmem:[#allocation4 + $0x8] sm:$0xff] %vm249_vm3, %v456_v17 }
 0x39f   :  { %v582_v18 = vpop.f32.mrf.mxu1  ;;  %v587_v19 = vpop.f32.mrf.mxu0 }
 0x3a0   :  { %644 = shalt.err (!%p641_p9)
}
 0x3a1   :  { %s663_s4 = smov 128   ;;  %s664_s14 = smov 8   ;;  %v459_v20 = vpop.f32.mrf.mxu0 }
 0x3a2   :  { %478 = dma.vmem_to_hbm [thread:$0]  %s473_s12, 256, %s769_s3, [#allocation5], %s663_s4, %s663_s4, %s664_s14  }
 0x3a3   :  { %v588_v21 = vpop.f32.mrf.mxu0 }
 0x3a4   :  { %653 = dma.done.wait [#allocation5], 256  }
 0x3a5   :  { %654 = vsyncadd [#allocation5], 4294967040 }
 0x3a6   :  { %655 = dma.done.wait [#allocation7], 128  }
 0x3a7   :  { %656 = vsyncadd [#allocation7], 4294967168 }
 0x3a8   :  { %497 = vsyncpa [#allocation5], 1 }
 0x3a9   :  { %498 = vsyncpa [#allocation7], 1 }

</bundles_post_ra>
